<compile_context>
chip_gen: v6e
topology: v6e:2x2x1
jax: 0.10.0
libtpu: 0.0.40
codegen_flags: <defaults>
</compile_context>

<pallas_src>
import functools

import jax
import jax.numpy as jnp
from jax import lax
from jax.experimental import pallas as pl
from jax.experimental.pallas import tpu as pltpu


def _sig2tf_kernel(S, T, m_max, x_ref, w_ref, o_ref):
    # x_ref: (1, S, T_ext)  stride-phase signal, T_ext = T + m_max - 1 (zero tail)
    # w_ref: (R, m_max*S)   stacked conv-bank weights, R = num_kernels * C
    # o_ref: (1, R, T)
    xr = x_ref[0]                                        # (S, T_ext)
    # Patch matrix P[j*S + s, t] = x_pad[t*S + j*S + s]: m_max lane-shifted
    # views of xr stacked on the sublane axis (static slices only).
    taps = [xr[:, j:j + T] for j in range(m_max)]
    patches = taps[0] if m_max == 1 else jnp.concatenate(taps, axis=0)  # (m_max*S, T)
    # One MXU contraction for every kernel size and every output channel.
    o_ref[0] = jnp.dot(w_ref[...], patches, preferred_element_type=jnp.float32)


def signal2timefreq(x, weights, kernel_sizes):
    """x: (N, 1, L) f32; weights: list of (C, 1, K_i) f32 in sorted-kernel order.

    Returns (N, num_kernels, C, T) with T = L // min(kernel_sizes).
    """
    ks = sorted(kernel_sizes)
    S = ks[0]
    N, cin, L = x.shape
    assert cin == 1 and L % S == 0
    C = weights[0].shape[0]
    num_k = len(ks)

    # PyTorch padding formula; torch.cat in the reference forward requires all
    # feature lengths to be equal, so assert that here.
    paddings = [int(S * (2 ** (k / S - 1) - 1)) for k in ks]
    out_lens = [(L + p - k) // S + 1 for p, k in zip(paddings, ks)]
    T = out_lens[0]
    assert all(t == T for t in out_lens), "feature lengths must match for concatenation"
    assert all(k % S == 0 for k in ks), "kernels must be divisible by the smallest kernel"
    m = [k // S for k in ks]
    m_max = max(m)
    T_ext = T + m_max - 1

    # ---- host-side layout plumbing (cheap XLA ops, no compute) ----
    # One shared right-padding covers every per-conv F.pad (extra indices are 0
    # in both formulations); fold the stride into the sublane axis.
    xp = jnp.pad(x[:, 0, :], ((0, 0), (0, T_ext * S - L)))
    xr = xp.reshape(N, T_ext, S).transpose(0, 2, 1)          # (N, S, T_ext)

    # Stack the whole conv bank into one weight matrix; shorter kernels get
    # zero-padded tap columns.
    R = num_k * C
    w_stacked = jnp.zeros((R, m_max * S), jnp.float32)
    for i, (k, w) in enumerate(zip(ks, weights)):
        w_stacked = w_stacked.at[i * C:(i + 1) * C, :k].set(w.reshape(C, k))

    kernel = functools.partial(_sig2tf_kernel, S, T, m_max)
    out = pl.pallas_call(
        kernel,
        out_shape=jax.ShapeDtypeStruct((N, R, T), jnp.float32),
        grid_spec=pltpu.PrefetchScalarGridSpec(
            num_scalar_prefetch=0,
            grid=(N,),
            in_specs=[
                pl.BlockSpec((1, S, T_ext), lambda n: (n, 0, 0)),   # signal (per batch)
                pl.BlockSpec((R, m_max * S), lambda n: (0, 0)),     # stacked weights (resident)
            ],
            out_specs=pl.BlockSpec((1, R, T), lambda n: (n, 0, 0)),
        ),
        compiler_params=pltpu.CompilerParams(
            dimension_semantics=("parallel",)),
    )(xr, w_stacked)
    return out.reshape(N, num_k, C, T)


# ----------------------------- pure-JAX reference -----------------------------
def _ref_signal2timefreq(x, weights, kernel_sizes):
    ks = sorted(kernel_sizes)
    S = ks[0]
    paddings = [int(S * (2 ** (k / S - 1) - 1)) for k in ks]
    feats = []
    for w, k, p in zip(weights, ks, paddings):
        xp = jnp.pad(x, ((0, 0), (0, 0), (0, p)))
        f = lax.conv_general_dilated(
            xp, w, window_strides=(S,), padding='VALID',
            dimension_numbers=('NCH', 'OIH', 'NCH'),
            precision=lax.Precision.HIGHEST)
        feats.append(f[:, None])
    return jnp.concatenate(feats, axis=1)


if __name__ == "__main__":
    key = jax.random.PRNGKey(0)

    # Small shapes consistent with the module: batch=2, 1-channel signal of
    # length 1024, kernel_sizes=[8, 16] (stride = 8), output_channels=64.
    # -> output (2, 2, 64, 128); T=128 keeps the output lane-dense.
    N, L, C = 2, 1024, 64
    kernel_sizes = [8, 16]

    kx, *kw = jax.random.split(key, 1 + len(kernel_sizes))
    x = jax.random.normal(kx, (N, 1, L), jnp.float32)
    weights = [
        jax.random.normal(kw[i], (C, 1, k), jnp.float32) * (1.0 / k) ** 0.5
        for i, k in enumerate(sorted(kernel_sizes))
    ]

    y = signal2timefreq(x, weights, kernel_sizes)
    y = jax.block_until_ready(y)

    ref = _ref_signal2timefreq(x, weights, kernel_sizes)
    assert y.shape == (N, len(kernel_sizes), C, L // min(kernel_sizes)), y.shape
    max_err = float(jnp.max(jnp.abs(y - ref)))
    assert jnp.allclose(y, ref, atol=2e-3, rtol=2e-3), max_err
    print("KERNEL_OK")
</pallas_src>

<mosaic_0001>
module attributes {stable_mosaic.version = 11 : i64} {
  func.func @_sig2tf_kernel(%arg0: i32, %arg1: memref<1x8x129xf32, #tpu.memory_space<vmem>>, %arg2: memref<128x16xf32, #tpu.memory_space<vmem>>, %arg3: memref<1x128x128xf32, #tpu.memory_space<vmem>>) attributes {dimension_semantics = [#tpu.dimension_semantics<parallel>], iteration_bounds = array<i64: 2>, scalar_prefetch = 0 : i64, scratch_operands = 0 : i64, tpu.core_type = #tpu.core_type<tc>, window_params = [{transform_indices = @transform_0, window_bounds = array<i64: 1, 8, 129>}, {pipeline_mode = #tpu.pipeline_mode<synchronous>, transform_indices = @transform_1, window_bounds = array<i64: 128, 16>}, {transform_indices = @transform_2, window_bounds = array<i64: 1, 128, 128>}]} {
    %c0 = arith.constant 0 : index
    %c0_0 = arith.constant 0 : index
    %c0_1 = arith.constant 0 : index
    %0 = vector.load %arg1[%c0, %c0_0, %c0_1] : memref<1x8x129xf32, #tpu.memory_space<vmem>>, vector<1x8x129xf32>
    %1 = vector.shape_cast %0 : vector<1x8x129xf32> to vector<8x129xf32>
    %2 = vector.extract_strided_slice %1 {offsets = [0, 0], sizes = [8, 128], strides = [1, 1]} : vector<8x129xf32> to vector<8x128xf32>
    %3 = vector.extract_strided_slice %1 {offsets = [0, 1], sizes = [8, 128], strides = [1, 1]} : vector<8x129xf32> to vector<8x128xf32>
    %4 = tpu.concatenate %2, %3 in 0 : vector<8x128xf32>, vector<8x128xf32> -> vector<16x128xf32>
    %c0_2 = arith.constant 0 : index
    %c0_3 = arith.constant 0 : index
    %5 = vector.load %arg2[%c0_2, %c0_3] : memref<128x16xf32, #tpu.memory_space<vmem>>, vector<128x16xf32>
    %cst = arith.constant dense<0.000000e+00> : vector<128x128xf32>
    %6 = tpu.matmul %5, %4, %cst {dimension_numbers = #tpu.dot_dimension_numbers<[1], [0], [0], [1], [0, 0, 1, 1], [], []>} : vector<128x16xf32>, vector<16x128xf32>, vector<128x128xf32> -> vector<128x128xf32>
    %c0_4 = arith.constant 0 : index
    %c0_5 = arith.constant 0 : index
    %c0_6 = arith.constant 0 : index
    %7 = vector.load %arg3[%c0_4, %c0_5, %c0_6] : memref<1x128x128xf32, #tpu.memory_space<vmem>>, vector<1x128x128xf32>
    %8 = vector.shape_cast %7 : vector<1x128x128xf32> to vector<128x128xf32>
    %9 = vector.shape_cast %6 : vector<128x128xf32> to vector<1x128x128xf32>
    tpu.vector_store %arg3[%c0_4, %c0_5, %c0_6], %9 {strides = array<i32>} : memref<1x128x128xf32, #tpu.memory_space<vmem>>, vector<1x128x128xf32>,
    return
  }
  func.func @transform_0(%arg0: i32) -> (i32, i32, i32) {
    %c0_i32 = arith.constant 0 : i32
    %c0_i32_0 = arith.constant 0 : i32
    %c0_i32_1 = arith.constant 0 : i32
    return %arg0, %c0_i32, %c0_i32_0 : i32, i32, i32
  }
  func.func @transform_1(%arg0: i32) -> (i32, i32) {
    %c0_i32 = arith.constant 0 : i32
    %c0_i32_0 = arith.constant 0 : i32
    %c0_i32_1 = arith.constant 0 : i32
    return %c0_i32, %c0_i32_0 : i32, i32
  }
  func.func @transform_2(%arg0: i32) -> (i32, i32, i32) {
    %c0_i32 = arith.constant 0 : i32
    %c0_i32_0 = arith.constant 0 : i32
    %c0_i32_1 = arith.constant 0 : i32
    return %arg0, %c0_i32, %c0_i32_0 : i32, i32, i32
  }
}

</mosaic_0001>

<bundles_post_ra>
// kernel: tpu_custom_call.1
= control target key start
LH: loop header
LB: loop body
LE: loop exit
PB: predicated region body
PF: predicated region fallthrough
CT: control target
= control target key end

     0   :  { %7 = vsyncpa [#allocation3], 0  ;;  %s847_s0 = inlined_call_operand.vmem [shape: f32[2,8,129], index: 0, kind: input, shape index: {}]   ;;  %s848_s1 = inlined_call_operand.vmem [shape: f32[128,16], index: 1, kind: input, shape index: {}]   ;;  %s849_s2 = inlined_call_operand.hbm [shape: f32[2,128,128], index: 2, kind: output, shape index: {}]  }
   0x1   :  { %9 = vsyncpa [#allocation3 + $0x1], 0  ;;  %s658_s9 = smov 0   ;;  %s660_s10 = smov 0  }
   0x2   :  { %s662_s11 = smov 0   ;;  %s664_s12 = smov 0  }
   0x3 LB: > { %s679_s13 = sadd.s32 4294967295, %s637_s12   ;;  %s455_s14 = sadd.s32 4294967294, %s637_s12   ;;  %s637_s12 = sphi %s664_s12, %s855_s12   ;;  %s633_s11 = sphi %s662_s11, %s854_s11   ;;  %s629_s10 = sphi %s660_s10, %s853_s10   ;;  %s625_s9 = sphi %s658_s9, %s852_s9  }
   0x4   : > { %s683_s15 = sadd.s32 1, %s637_s12   ;;  %s69_s16 = sadd.s32 1, %s633_s11 }
   0x5   : > { %s66_s17 = ssub.s32 %s637_s12, %s683_s15  ;;  %p79_p0 = scmp.ne.s32.totalorder %s633_s11, %s629_s10 }
   0x6   : > { %p67_p1 = scmp.eq.s32.totalorder %s66_s17, 0  ;;  %p80_p2 = scmp.eq.s32.totalorder %s679_s13, 1 }
   0x7   : > { %p85_p3 = scmp.ne.s32.totalorder %s629_s10, %s625_s9  ;;  %p86_p4 = scmp.eq.s32.totalorder %s455_s14, 1 }
   0x8   : > { %s694_s18 = scalar_select %p67_p1, %s633_s11, %s69_s16  }
   0x9   : > { %p696_p5 = por %p80_p2, %p79_p0  ;;  %p700_p6 = por %p86_p4, %p85_p3 }
   0xa   : > { %p458_p7 = scmp.ge.s32.totalorder %s637_s12, 1  ;;  %p115_p8 = scmp.lt.s32.totalorder %s637_s12, 3 }
   0xc   : > { %p116_p9 = pnand %p458_p7, %p115_p8 }
   0xd   : > { %p137_p10 = scmp.lt.s32.totalorder (!%p116_p9), %s679_s13, 1  ;;  %s639_s30 = smov (!%p116_p9), 127  }
   0xe   : > { %119 = sbr.rel (%p116_p9) target bundleno = 369 (0x171), region = 28  ;;  %s134_s21 = sand.u32 (!%p116_p9), 1, %s629_s10  }
   0xf   : > { %s459_s22 = sshll.u32 (!%p116_p9), %s134_s21, 7  ;;  %s484_s24 = sshll.u32 (!%p116_p9), %s679_s13, 11 }
  0x10   : > { %s778_s23 = scalar_lea.vmem (!%p116_p9), [#allocation2], %s459_s22  ;;  %s797_s28 = scalar_lea.hbm (!%p116_p9), %s849_s2, %s484_s24 }
  0x13   : > { %v153_v0 = vld [vmem:[%s848_s1] sm:$0xff]  ;;  %vm169_vm0 = vcmask 130048   ;;  %s138_s25 = scalar_select %p137_p10, %s679_s13, 1  ;;  %vm150_vm1 = vcmask 1039360   ;;  %v154_v7 = vld [vmem:[%s848_s1 + $0x8] sm:$0xff]  ;;  %v155_v9 = vld [vmem:[%s848_s1 + $0x10] sm:$0xff] }
  0x14   : > { %v161_v1 = vld [vmem:[%s848_s1 + $0x40] sm:$0xff]  ;;  %507 = vmatprep.mubr.msk.f32.mxu0 %vm169_vm0, %v153_v0  ;;  %v162_v8 = vld [vmem:[%s848_s1 + $0x48] sm:$0xff]  ;;  %v163_v10 = vld [vmem:[%s848_s1 + $0x50] sm:$0xff]  ;;  %s807_s13 = scalar_lea.sflag [#allocation3], %s134_s21 }
  0x15   : > { %519 = vmatprep.mubr.msk.f32.mxu1 %vm169_vm0, %v161_v1  ;;  %s483_s26 = sshll.u32 %s138_s25, 4  ;;  %v156_v11 = vld [vmem:[%s848_s1 + $0x18] sm:$0xff]  ;;  %v157_v13 = vld [vmem:[%s848_s1 + $0x20] sm:$0xff]  ;;  %v158_v15 = vld [vmem:[%s848_s1 + $0x28] sm:$0xff]  ;;  %s393_s25 = sshll.u32 %s778_s23, 4  ;;  %s799_s25 = int_to_ptr.vmem [resolvable:$true] %s393_s25 }
  0x16   : > { %s141_s29 = scalar_lea.vmem %s847_s0, %s483_s26  ;;  %v164_v12 = vld [vmem:[%s848_s1 + $0x58] sm:$0xff]  ;;  %v165_v14 = vld [vmem:[%s848_s1 + $0x60] sm:$0xff]  ;;  %v166_v16 = vld [vmem:[%s848_s1 + $0x68] sm:$0xff] }
  0x17   : > { %v142_v2 = vld [vmem:[%s141_s29] sm:$0xff]  ;;  %v143_v3 = vld [vmem:[%s141_s29 + $0x8] sm:$0xff]  ;;  %v159_v17 = vld [vmem:[%s848_s1 + $0x30] sm:$0xff]  ;;  %s577_s29 = scalar_lea.vmem %s799_s25, 2048 }
  0x18   : > { %146 = vrot.lane.b32.xlu0 %v142_v2, %s639_s30  ;;  %v167_v18 = vld [vmem:[%s848_s1 + $0x70] sm:$0xff]  ;;  %v160_v19 = vld [vmem:[%s848_s1 + $0x38] sm:$0xff]  ;;  %p578_p11 = scmp.ne.s32.totalorder %s799_s25, %s577_s29 }
  0x19   : > { %v168_v20 = vld [vmem:[%s848_s1 + $0x78] sm:$0xff] }
  0x1a   : > { %p579_p12 = pnand %p578_p11, %p696_p5 }
  0x1c   : > { %148 = vrot.lane.b32.xlu0 %v143_v3, %s639_s30  ;;  %p580_p13 = pneg %p579_p12  ;;  %s640_s30 = smov [#allocation2]  }
  0x1d   : > { %s581_s3 = sshll.u32 %s640_s30, 4  ;;  %s582_s3 = int_to_ptr.vmem [resolvable:$false] %s581_s3 }
  0x1e   : > { %s583_s4 = scalar_lea.vmem %s582_s3, 4096  ;;  %p584_p0 = scmp.lt.s32.totalorder %s799_s25, %s582_s3 }
  0x1f   : > { %p585_p1 = scmp.lt.s32.totalorder %s583_s4, %s577_s29 }
  0x21   : > { %p586_p2 = por %p585_p1, %p584_p0 }
  0x23   : > { %p587_p3 = pnand %p586_p2, %p580_p13 }
  0x8a   : > { %v147_v4 = vpop.permute.xlu0 %146 }
  0x8e   : > { %v149_v5 = vpop.permute.xlu0 %148 }
  0x8f   : > { %v151_v6 = vsel %vm150_vm1, %v147_v4, %v149_v5 }
  0x90   : > { %503 = vmatprep.subr.mxu0 %v151_v6  ;;  %531 = vmatprep.subr.mxu1 %v151_v6 }
  0x91   : > { %504 = vmatpush3.msra.mxu0 %v151_v6  ;;  %533 = vmatpush3.msra.mxu1 %v151_v6 }
  0x92   : > { %505 = vmatprep.subr.mxu0 %v142_v2  ;;  %532 = vmatprep.subr.mxu1 %v142_v2 }
  0x93   : > { %506 = vmatpush3.msra.mxu0 %v142_v2  ;;  %534 = vmatpush3.msra.mxu1 %v142_v2 }
  0x94   : > { %508 = vmatmul.mubr.msk.f32.vlgmr.msra.gmra.mxu0 %vm169_vm0, %v154_v7  ;;  %520 = vmatmul.mubr.msk.f32.vlgmr.msra.gmra.mxu1 %vm169_vm0, %v162_v8 }
  0x95   : > { %510 = vmatprep.mubr.msk.f32.mxu0 %vm169_vm0, %v155_v9  ;;  %522 = vmatprep.mubr.msk.f32.mxu1 %vm169_vm0, %v163_v10 }
  0x98   : > { %511 = vmatmul.mubr.msk.f32.gmra.mxu0 %vm169_vm0, %v156_v11  ;;  %523 = vmatmul.mubr.msk.f32.gmra.mxu1 %vm169_vm0, %v164_v12 }
  0x99   : > { %513 = vmatprep.mubr.msk.f32.mxu0 %vm169_vm0, %v157_v13  ;;  %525 = vmatprep.mubr.msk.f32.mxu1 %vm169_vm0, %v165_v14 }
  0x9c   : > { %514 = vmatmul.mubr.msk.f32.gmra.mxu0 %vm169_vm0, %v158_v15  ;;  %526 = vmatmul.mubr.msk.f32.gmra.mxu1 %vm169_vm0, %v166_v16 }
  0x9d   : > { %516 = vmatprep.mubr.msk.f32.mxu0 %vm169_vm0, %v159_v17  ;;  %528 = vmatprep.mubr.msk.f32.mxu1 %vm169_vm0, %v167_v18 }
  0xa0   : > { %517 = vmatmul.mubr.msk.f32.gmra.mxu0 %vm169_vm0, %v160_v19  ;;  %529 = vmatmul.mubr.msk.f32.gmra.mxu1 %vm169_vm0, %v168_v20 }
 0x154   : > { %v509_v21 = vpop.f32.mrf.mxu0  ;;  %v521_v22 = vpop.f32.mrf.mxu1 }
 0x155   : > { %364 = vst [vmem:[%s778_s23 + $0x8] sm:$0xff] %v509_v21  ;;  %372 = vst [vmem:[%s778_s23 + $0x48] sm:$0xff] %v521_v22 }
 0x156   : > { %v284_v23 = vpop.f32.mrf.mxu0  ;;  %v324_v24 = vpop.f32.mrf.mxu1 }
 0x157   : > { %363 = vst [vmem:[%s778_s23] sm:$0xff] %v284_v23  ;;  %371 = vst [vmem:[%s778_s23 + $0x40] sm:$0xff] %v324_v24 }
 0x158   : > { %v512_v25 = vpop.f32.mrf.mxu0  ;;  %v524_v26 = vpop.f32.mrf.mxu1 }
 0x159   : > { %366 = vst [vmem:[%s778_s23 + $0x18] sm:$0xff] %v512_v25  ;;  %374 = vst [vmem:[%s778_s23 + $0x58] sm:$0xff] %v524_v26 }
 0x15a   : > { %v294_v27 = vpop.f32.mrf.mxu0  ;;  %v334_v28 = vpop.f32.mrf.mxu1 }
 0x15b   : > { %365 = vst [vmem:[%s778_s23 + $0x10] sm:$0xff] %v294_v27  ;;  %373 = vst [vmem:[%s778_s23 + $0x50] sm:$0xff] %v334_v28 }
 0x15c   : > { %v515_v29 = vpop.f32.mrf.mxu0  ;;  %v527_v30 = vpop.f32.mrf.mxu1 }
 0x15d   : > { %368 = vst [vmem:[%s778_s23 + $0x28] sm:$0xff] %v515_v29  ;;  %376 = vst [vmem:[%s778_s23 + $0x68] sm:$0xff] %v527_v30 }
 0x15e   : > { %v304_v31 = vpop.f32.mrf.mxu0  ;;  %v344_v32 = vpop.f32.mrf.mxu1 }
 0x15f   : > { %367 = vst [vmem:[%s778_s23 + $0x20] sm:$0xff] %v304_v31  ;;  %375 = vst [vmem:[%s778_s23 + $0x60] sm:$0xff] %v344_v32 }
 0x160   : > { %v518_v33 = vpop.f32.mrf.mxu0  ;;  %v530_v34 = vpop.f32.mrf.mxu1 }
 0x161   : > { %370 = vst [vmem:[%s778_s23 + $0x38] sm:$0xff] %v518_v33  ;;  %378 = vst [vmem:[%s778_s23 + $0x78] sm:$0xff] %v530_v34 }
 0x162   : > { %v314_v35 = vpop.f32.mrf.mxu0  ;;  %v354_v36 = vpop.f32.mrf.mxu1 }
 0x163   : > { %369 = vst [vmem:[%s778_s23 + $0x30] sm:$0xff] %v314_v35  ;;  %377 = vst [vmem:[%s778_s23 + $0x70] sm:$0xff] %v354_v36 }
 0x164   : > { %590 = shalt.err (!%p587_p3)
}
 0x165   : > { %s591_s5 = scalar_lea.hbm %s797_s28, 2048  ;;  %s595_s8 = scalar_lea.hbm %s849_s2, 4096 }
 0x166   : > { %p592_p4 = scmp.ne.s32.totalorder %s797_s28, %s591_s5  ;;  %p596_p9 = scmp.lt.s32.totalorder %s797_s28, %s849_s2 }
 0x167   : > { %p597_p10 = scmp.lt.s32.totalorder %s595_s8, %s591_s5 }
 0x168   : > { %p593_p7 = pnand %p592_p4, %p696_p5 }
 0x169   : > { %p598_p11 = por %p597_p10, %p596_p9 }
 0x16a   : > { %p594_p8 = pneg %p593_p7 }
 0x16c   : > { %p599_p12 = pnand %p598_p11, %p594_p8 }
 0x16e   : > { %602 = shalt.err (!%p599_p12)
}
 0x16f   : > { %s641_s17 = smov 128   ;;  %s642_s21 = smov 8  }
 0x170   : > { %535 = dma.vmem_to_hbm [thread:$0]  (%p696_p5), %s799_s25, 2048, %s797_s28, %s807_s13, %s641_s17, %s641_s17, %s642_s21  }
 0x171 PF: > { %p541_p13 = scmp.ge.s32.totalorder %s637_s12, 2  ;;  %s408_s22 = sand.u32 1, %s625_s9  }
 0x172   : > { %s409_s23 = scalar_lea.sflag [#allocation3], %s408_s22 }
 0x173   : > { %p538_p0 = pnand %p541_p13, %p700_p6 }
 0x175   : > { %p539_p1 = pneg %p538_p0 }
 0x177   : > { %620 = dma.done.wait (%p539_p1), %s409_s23, 2048  }
 0x178   : > { %622 = vsyncadd (%p539_p1), %s409_s23, 4294965248  ;;  %p12_p2 = scmp.ge.s32.totalorder %s683_s15, 4   ;;  %s852_s9 = smov %s629_s10 }
 0x179   : > { %s853_s10 = smov %s633_s11  ;;  %s854_s11 = smov %s694_s18 }
 0x17a   : > { %s855_s12 = smov %s683_s15  ;;  %14 = sbr.rel (!%p12_p2) target bundleno = 3 (0x3), region = 63 }
 0x17f   :  { %414 = vsyncpa [#allocation3], 1 }
 0x180   :  { %416 = vsyncpa [#allocation3 + $0x1], 1 }

</bundles_post_ra>
